<compile_context>
chip_gen: v7x
topology: tpu7x:2x2x1
jax: 0.10.0
libtpu: 0.0.40
codegen_flags: <defaults>
</compile_context>

<pallas_src>
import functools

import jax
import jax.numpy as jnp
from jax.experimental import pallas as pl
from jax.experimental.pallas import tpu as pltpu


# --------------------------------------------------------------------------- #
# Kernel: per (batch, spatial-tile) block — sSE 1x1 conv + fused cSE/sSE gating.
# --------------------------------------------------------------------------- #
def scse_apply_kernel(x_ref, w3_ref, b3_ref, cgate_ref, o_ref, *, mxu_bf16):
    # x_ref block: (1, C, THW) in the I/O dtype (C on sublanes, spatial on lanes).
    x = x_ref[0]                                              # (C, THW)

    # sSE branch: 1x1 conv (C_out x C_in) as one MXU matmul over the tile.
    if mxu_bf16:
        # f32 I/O but large C: bf16 operands + f32 accumulate (~3x MXU throughput).
        s = jnp.dot(w3_ref[...].astype(jnp.bfloat16), x.astype(jnp.bfloat16),
                    preferred_element_type=jnp.float32)
    else:
        s = jnp.dot(w3_ref[...], x, preferred_element_type=jnp.float32)
    s = s + b3_ref[...]                                       # b3: (C, 1), broadcasts over lanes

    # Exact sigmoid via a single EUP transcendental: sigmoid(s) = 0.5*tanh(s/2) + 0.5.
    sgate = 0.5 * jnp.tanh(0.5 * s) + 0.5                     # (C, THW) f32

    # Fused gating: out = x * (cSE + sSE).  cgate block is (C, 1) f32, broadcast over lanes.
    gate = cgate_ref[0] + sgate                               # (C, THW) f32
    o_ref[0] = (x * gate).astype(o_ref.dtype)                 # store in the output dtype


# --------------------------------------------------------------------------- #
# Hardware / tiling helpers.
# --------------------------------------------------------------------------- #
def _vmem_capacity_bytes():
    try:
        cap = getattr(pltpu.get_tpu_info(), "vmem_capacity_bytes", None)
        if cap:
            return int(cap)
    except Exception:
        pass
    return 64 << 20  # conservative fallback = v7x per-TensorCore VMEM


def _pick_spatial_tile(hw, n, c, in_isz, out_isz, *, vmem_budget,
                       max_tile=8192, min_total_steps=8):
    """Spatial tile: a multiple of 128 that divides round_up(hw, 128) (so padding
    stays < 128 columns), as large as the VMEM budget allows while keeping at
    least ~min_total_steps grid steps for pipelining / core sharding."""
    hw128 = ((hw + 127) // 128) * 128
    m = hw128 // 128
    per_col = c * 2 * (in_isz + out_isz)                      # double-buffered in + out
    cap = min(max_tile, max(128, (vmem_budget // max(per_col, 1)) // 128 * 128))
    steps_cap = max(128, ((hw128 * n) // max(min_total_steps, 1)) // 128 * 128)
    limit = min(cap, steps_cap, hw128) // 128                 # max tile, in 128-lane units
    best = 1
    for d in range(1, m + 1):
        if m % d == 0 and d <= limit:
            best = d
    return 128 * best


# --------------------------------------------------------------------------- #
# Wrapper: cSE branch in plain XLA, sSE + gating in Pallas.
# --------------------------------------------------------------------------- #
def scse_forward(x_nchw, w1, b1, w2, b2, w3, b3, *, io_dtype=None, out_dtype=None):
    """x_nchw: (N, C, H, W).
    w1: (C, Cmid), b1: (Cmid,), w2: (Cmid, C), b2: (C,)   -- cSE FCs ((in, out) layout)
    w3: (C, C) with w3[out, in], b3: (C,)                 -- sSE 1x1 conv
    io_dtype:  dtype of the x / w3 HBM->VMEM path. Defaults to x.dtype (feed bf16
               activations directly on v6e/v7x to avoid any wrapper cast pass).
    out_dtype: dtype of the kernel output (defaults to io_dtype -> bf16 output on
               the bf16 path halves writeback traffic for this HBM-bound op).
    """
    N, C, H, W = x_nchw.shape
    HW = H * W

    io_dtype = jnp.dtype(io_dtype) if io_dtype is not None else jnp.dtype(x_nchw.dtype)
    out_dtype = jnp.dtype(out_dtype) if out_dtype is not None else io_dtype

    x = x_nchw.reshape(N, C, HW)                              # NCHW is channels-major already
    if x.dtype != io_dtype:
        x = x.astype(io_dtype)                                # single cast pass (avoid by feeding io_dtype)

    # ---- cSE branch hoisted out of the kernel (one read pass, f32 accumulation) ----
    mean = jnp.mean(x, axis=2, dtype=jnp.float32)             # (N, C)
    z1 = jnp.maximum(mean @ w1 + b1, 0.0)                     # (N, Cmid)
    cgate = jax.nn.sigmoid(z1 @ w2 + b2)                      # (N, C)
    cgate = cgate.reshape(N, C, 1).astype(jnp.float32)

    # ---- tiling: derive from chip VMEM; pad HW to a multiple of the tile ----
    in_isz = io_dtype.itemsize
    out_isz = out_dtype.itemsize
    vmem_cap = _vmem_capacity_bytes()
    resident_bytes = 2 * (C * C * in_isz + 2 * C * 4)         # w3 + b3 + cgate (double-buffered)
    vmem_budget = max(4 << 20, (vmem_cap * 3) // 8 - resident_bytes)   # ~24 MiB v7x, ~48 MiB v5e/v6e
    THW = _pick_spatial_tile(HW, N, C, in_isz, out_isz, vmem_budget=vmem_budget)

    HW_pad = ((HW + THW - 1) // THW) * THW
    if HW_pad != HW:
        x = jnp.pad(x, ((0, 0), (0, 0), (0, HW_pad - HW)))    # padded lanes: x=0 -> out=0, sliced off
    grid = (N, HW_pad // THW)

    w3_io = w3.astype(io_dtype)
    b3_col = b3.reshape(C, 1).astype(jnp.float32)
    mxu_bf16 = bool(io_dtype == jnp.dtype(jnp.float32) and C >= 256)

    # Scoped VMEM: double-buffered blocks + resident operands + headroom, capped
    # well below physical VMEM (~40 MiB on v7x, ~80 MiB on v5e/v6e).
    tile_bytes = 2 * C * THW * (in_isz + out_isz)
    vmem_limit = int(min(max(tile_bytes + resident_bytes + (4 << 20), 16 << 20),
                         (vmem_cap * 5) // 8))

    out = pl.pallas_call(
        functools.partial(scse_apply_kernel, mxu_bf16=mxu_bf16),
        out_shape=jax.ShapeDtypeStruct((N, C, HW_pad), out_dtype),
        grid_spec=pltpu.PrefetchScalarGridSpec(
            num_scalar_prefetch=0,
            grid=grid,
            in_specs=[
                # x: tiled over (batch, spatial); default 2-deep buffering.
                pl.BlockSpec((1, C, THW), lambda n, t: (n, 0, t)),
                # w3 / b3: whole tensor, constant index map -> resident, no re-DMA.
                pl.BlockSpec((C, C), lambda n, t: (0, 0)),
                pl.BlockSpec((C, 1), lambda n, t: (0, 0)),
                # cgate: one (C, 1) column per batch element.
                pl.BlockSpec((1, C, 1), lambda n, t: (n, 0, 0)),
            ],
            out_specs=pl.BlockSpec((1, C, THW), lambda n, t: (n, 0, t)),
        ),
        compiler_params=pltpu.CompilerParams(
            dimension_semantics=("parallel", "parallel"),      # no reduction axis
            vmem_limit_bytes=vmem_limit,
        ),
    )(x, w3_io, b3_col, cgate)

    if HW_pad != HW:
        out = out[:, :, :HW]
    return out.reshape(N, C, H, W)


# --------------------------------------------------------------------------- #
# Plain-JAX reference mirroring the PyTorch module (NCHW, full f32).
# --------------------------------------------------------------------------- #
def scse_reference(x, w1, b1, w2, b2, w3, b3):
    mean = jnp.mean(x, axis=(2, 3))                           # (N, C)
    z1 = jnp.maximum(mean @ w1 + b1, 0.0)                     # (N, Cmid)
    cgate = jax.nn.sigmoid(z1 @ w2 + b2)[:, :, None, None]
    s = jnp.einsum("nchw,dc->ndhw", x, w3,
                   precision=jax.lax.Precision.HIGHEST) + b3[None, :, None, None]
    sgate = jax.nn.sigmoid(s)
    return x * cgate + x * sgate


if __name__ == "__main__":
    # ch // re must be >= 1, so use C=32 with the default re=16.
    N, C, re_ = 2, 32, 16
    Cmid = max(C // re_, 1)

    key = jax.random.PRNGKey(0)
    kx1, kx2, k1, kb1, k2, kb2, k3, kb3 = jax.random.split(key, 8)

    # 1x1-conv weights; w1/w2 as (in, out) for the cSE FCs, w3 as (out, in)
    # (matching PyTorch Conv2d weight[out, in, 0, 0]).
    w1 = jax.random.normal(k1, (C, Cmid), dtype=jnp.float32) * 0.1
    b1 = jax.random.normal(kb1, (Cmid,), dtype=jnp.float32) * 0.1
    w2 = jax.random.normal(k2, (Cmid, C), dtype=jnp.float32) * 0.1
    b2 = jax.random.normal(kb2, (C,), dtype=jnp.float32) * 0.1
    w3 = jax.random.normal(k3, (C, C), dtype=jnp.float32) * 0.1
    b3 = jax.random.normal(kb3, (C,), dtype=jnp.float32) * 0.1

    # Case 1: HW multiple of 128 (16x16), f32 in / f32 out (exact sigmoid -> tight tol).
    x1 = jax.random.normal(kx1, (N, C, 16, 16), dtype=jnp.float32)
    ref1 = scse_reference(x1, w1, b1, w2, b2, w3, b3)
    out1 = jax.block_until_ready(scse_forward(x1, w1, b1, w2, b2, w3, b3))
    assert out1.shape == ref1.shape and out1.dtype == jnp.float32
    err1 = float(jnp.max(jnp.abs(out1 - ref1)))
    assert jnp.allclose(out1, ref1, atol=5e-3, rtol=5e-3), f"f32 max err {err1}"

    # Case 2: ragged HW (14x14 -> padded to a multiple of 128 inside the wrapper),
    # bf16 I/O and bf16 output (recommended on v6e/v7x; halves HBM traffic).
    x2 = jax.random.normal(kx2, (N, C, 14, 14), dtype=jnp.float32)
    ref2 = scse_reference(x2, w1, b1, w2, b2, w3, b3)
    out2 = jax.block_until_ready(
        scse_forward(x2.astype(jnp.bfloat16), w1, b1, w2, b2, w3, b3))
    assert out2.shape == ref2.shape and out2.dtype == jnp.bfloat16
    err2 = float(jnp.max(jnp.abs(out2.astype(jnp.float32) - ref2)))
    assert jnp.allclose(out2.astype(jnp.float32), ref2,
                        atol=7e-2, rtol=7e-2), f"bf16 max err {err2}"

    print("KERNEL_OK")
</pallas_src>

<mosaic_0001>
module attributes {stable_mosaic.version = 11 : i64} {
  func.func @scse_apply_kernel(%arg0: i32, %arg1: i32, %arg2: memref<1x32x128xf32, #tpu.memory_space<vmem>>, %arg3: memref<32x32xf32, #tpu.memory_space<vmem>>, %arg4: memref<32x1xf32, #tpu.memory_space<vmem>>, %arg5: memref<1x32x1xf32, #tpu.memory_space<vmem>>, %arg6: memref<1x32x128xf32, #tpu.memory_space<vmem>>) attributes {dimension_semantics = [#tpu.dimension_semantics<parallel>, #tpu.dimension_semantics<parallel>], iteration_bounds = array<i64: 2, 2>, scalar_prefetch = 0 : i64, scratch_operands = 0 : i64, tpu.core_type = #tpu.core_type<tc>, window_params = [{transform_indices = @transform_0, window_bounds = array<i64: 1, 32, 128>}, {pipeline_mode = #tpu.pipeline_mode<synchronous>, transform_indices = @transform_1, window_bounds = array<i64: 32, 32>}, {pipeline_mode = #tpu.pipeline_mode<synchronous>, transform_indices = @transform_2, window_bounds = array<i64: 32, 1>}, {transform_indices = @transform_3, window_bounds = array<i64: 1, 32, 1>}, {transform_indices = @transform_4, window_bounds = array<i64: 1, 32, 128>}]} {
    %c0 = arith.constant 0 : index
    %c0_0 = arith.constant 0 : index
    %c0_1 = arith.constant 0 : index
    %0 = vector.load %arg2[%c0, %c0_0, %c0_1] : memref<1x32x128xf32, #tpu.memory_space<vmem>>, vector<1x32x128xf32>
    %1 = vector.shape_cast %0 : vector<1x32x128xf32> to vector<32x128xf32>
    %c0_2 = arith.constant 0 : index
    %c0_3 = arith.constant 0 : index
    %2 = vector.load %arg3[%c0_2, %c0_3] : memref<32x32xf32, #tpu.memory_space<vmem>>, vector<32x32xf32>
    %cst = arith.constant dense<0.000000e+00> : vector<32x128xf32>
    %3 = tpu.matmul %2, %1, %cst {dimension_numbers = #tpu.dot_dimension_numbers<[1], [0], [0], [1], [0, 0, 1, 1], [], []>} : vector<32x32xf32>, vector<32x128xf32>, vector<32x128xf32> -> vector<32x128xf32>
    %c0_4 = arith.constant 0 : index
    %c0_5 = arith.constant 0 : index
    %4 = vector.load %arg4[%c0_4, %c0_5] : memref<32x1xf32, #tpu.memory_space<vmem>>, vector<32x1xf32>
    %5 = vector.broadcast %4 : vector<32x1xf32> to vector<32x128xf32>
    %6 = arith.addf %3, %5 : vector<32x128xf32>
    %cst_6 = arith.constant 5.000000e-01 : f32
    %7 = vector.broadcast %cst_6 : f32 to vector<32x128xf32>
    %8 = arith.mulf %7, %6 : vector<32x128xf32>
    %9 = math.tanh %8 : vector<32x128xf32>
    %cst_7 = arith.constant 5.000000e-01 : f32
    %10 = vector.broadcast %cst_7 : f32 to vector<32x128xf32>
    %11 = arith.mulf %10, %9 : vector<32x128xf32>
    %cst_8 = arith.constant 5.000000e-01 : f32
    %12 = vector.broadcast %cst_8 : f32 to vector<32x128xf32>
    %13 = arith.addf %11, %12 : vector<32x128xf32>
    %c0_9 = arith.constant 0 : index
    %c0_10 = arith.constant 0 : index
    %c0_11 = arith.constant 0 : index
    %14 = vector.load %arg5[%c0_9, %c0_10, %c0_11] : memref<1x32x1xf32, #tpu.memory_space<vmem>>, vector<1x32x1xf32>
    %15 = vector.shape_cast %14 : vector<1x32x1xf32> to vector<32x1xf32>
    %16 = vector.broadcast %15 : vector<32x1xf32> to vector<32x128xf32>
    %17 = arith.addf %16, %13 : vector<32x128xf32>
    %18 = arith.mulf %1, %17 : vector<32x128xf32>
    %c0_12 = arith.constant 0 : index
    %c0_13 = arith.constant 0 : index
    %c0_14 = arith.constant 0 : index
    %19 = vector.load %arg6[%c0_12, %c0_13, %c0_14] : memref<1x32x128xf32, #tpu.memory_space<vmem>>, vector<1x32x128xf32>
    %20 = vector.shape_cast %19 : vector<1x32x128xf32> to vector<32x128xf32>
    %21 = vector.shape_cast %18 : vector<32x128xf32> to vector<1x32x128xf32>
    tpu.vector_store %arg6[%c0_12, %c0_13, %c0_14], %21 {strides = array<i32>} : memref<1x32x128xf32, #tpu.memory_space<vmem>>, vector<1x32x128xf32>,
    return
  }
  func.func @transform_0(%arg0: i32, %arg1: i32) -> (i32, i32, i32) {
    %c0_i32 = arith.constant 0 : i32
    %c0_i32_0 = arith.constant 0 : i32
    return %arg0, %c0_i32, %arg1 : i32, i32, i32
  }
  func.func @transform_1(%arg0: i32, %arg1: i32) -> (i32, i32) {
    %c0_i32 = arith.constant 0 : i32
    %c0_i32_0 = arith.constant 0 : i32
    %c0_i32_1 = arith.constant 0 : i32
    return %c0_i32, %c0_i32_0 : i32, i32
  }
  func.func @transform_2(%arg0: i32, %arg1: i32) -> (i32, i32) {
    %c0_i32 = arith.constant 0 : i32
    %c0_i32_0 = arith.constant 0 : i32
    %c0_i32_1 = arith.constant 0 : i32
    return %c0_i32, %c0_i32_0 : i32, i32
  }
  func.func @transform_3(%arg0: i32, %arg1: i32) -> (i32, i32, i32) {
    %c0_i32 = arith.constant 0 : i32
    %c0_i32_0 = arith.constant 0 : i32
    %c0_i32_1 = arith.constant 0 : i32
    return %arg0, %c0_i32, %c0_i32_0 : i32, i32, i32
  }
  func.func @transform_4(%arg0: i32, %arg1: i32) -> (i32, i32, i32) {
    %c0_i32 = arith.constant 0 : i32
    %c0_i32_0 = arith.constant 0 : i32
    return %arg0, %c0_i32, %arg1 : i32, i32, i32
  }
}

</mosaic_0001>

<bundles_post_ra>
// kernel: tpu_custom_call.1
= control target key start
LH: loop header
LB: loop body
LE: loop exit
PB: predicated region body
PF: predicated region fallthrough
CT: control target
= control target key end

     0   :  { %9 = vsyncpa [#allocation3], 0  ;;  %s1113_s0 = inlined_call_operand.hbm [shape: f32[2,32,256], index: 0, kind: input, shape index: {}]   ;;  %s1114_s1 = inlined_call_operand.vmem [shape: f32[32,32], index: 1, kind: input, shape index: {}]   ;;  %s1115_s2 = inlined_call_operand.vmem [shape: f32[32,1], index: 2, kind: input, shape index: {}]   ;;  %s1116_s3 = inlined_call_operand.vmem [shape: f32[2,32,1], index: 3, kind: input, shape index: {}]   ;;  %s1117_s4 = inlined_call_operand.hbm [shape: f32[2,32,256], index: 4, kind: output, shape index: {}]  }
   0x1   :  { %11 = vsyncpa [#allocation3 + $0x1], 0 }
   0x2   :  { %12 = vsyncpa [#allocation4], 0 }
   0x3   :  { %14 = vsyncpa [#allocation4 + $0x1], 0  ;;  %s865_s15 = smov 0   ;;  %s867_s16 = smov 0  }
   0x4   :  { %s869_s17 = smov 0   ;;  %s871_s18 = smov 0  }
   0x5   :  { %s873_s19 = smov 0   ;;  %s875_s20 = smov 0  }
   0x6   :  { %s877_s21 = smov 0   ;;  %s879_s22 = smov 0  }
   0x7 LB: > { %s550_s23 = sadd.s32 4294967295, %s829_s22   ;;  %s551_s24 = sadd.s32 4294967294, %s829_s22   ;;  %s829_s22 = sphi %s879_s22, %s20_s22   ;;  %s825_s21 = sphi %s877_s21, %s1138_s21   ;;  %s821_s20 = sphi %s875_s20, %s1137_s20   ;;  %s817_s19 = sphi %s873_s19, %s1136_s19   ;;  %s813_s18 = sphi %s871_s18, %s1135_s18   ;;  %s809_s17 = sphi %s869_s17, %s1134_s17   ;;  %s805_s16 = sphi %s867_s16, %s1133_s16   ;;  %s801_s15 = sphi %s865_s15, %s1132_s15  }
   0x8   : > { %s29_s25 = sadd.s32 1, %s821_s20  ;;  %s32_s26 = sadd.s32 1, %s825_s21 }
   0x9   : > { %p30_p0 = scmp.ge.s32.totalorder %s29_s25, 2  ;;  %s41_s27 = sadd.s32 1, %s809_s17 }
   0xa   : > { %p48_p1 = scmp.ne.s32.totalorder %s809_s17, %s805_s16  ;;  %p49_p2 = scmp.eq.s32.totalorder %s829_s22, 0 }
   0xb   : > { %s1140_s25 = smov (%p30_p0, %s29_s25), 0  ;;  %s1142_s26 = smov (!%p30_p0, %s32_s26), %s825_s21 }
   0xc   : > { %1121 = sst [smem:[#allocation8_spill]] %s1140_s25  ;;  %s37_s28 = ssub.s32 %s821_s20, %s1140_s25 }
   0xd   : > { %p918_p3 = por %p49_p2, %p48_p1  ;;  %p34_p4 = scmp.ge.s32.totalorder %s1142_s26, 2 }
   0xe   : > { %p54_p5 = scmp.ne.s32.totalorder %s805_s16, %s801_s15  ;;  %p55_p6 = scmp.eq.s32.totalorder %s550_s23, 0 }
   0xf   : > { %p148_p7 = scmp.eq.s32.totalorder %s550_s23, 3  ;;  %s1144_s26 = smov (%p34_p4, %s1142_s26), 0 }
  0x10   : > { %1123 = sst [smem:[#allocation9_spill]] %s1144_s26  ;;  %p926_p8 = por %p55_p6, %p54_p5 }
  0x11   : > { %p930_p9 = por %p148_p7, %p48_p1  ;;  %s36_s6 = ssub.s32 %s825_s21, %s1144_s26 }
  0x12   : > { %p154_p10 = scmp.eq.s32.totalorder %s551_s24, 3  ;;  %s38_s7 = sor.u32 %s37_s28, %s36_s6 }
  0x13   : > { %s1125_s5 = scalar_select %p930_p9, 1, 0 }
  0x14   : > { %p39_p11 = scmp.eq.s32.totalorder %s38_s7, 0  ;;  %p936_p12 = por %p154_p10, %p54_p5 }
  0x15   : > { %p618_p13 = scmp.lt.s32.totalorder %s829_s22, 4  ;;  %s180_s9 = sand.u32 1, %s809_s17  }
  0x16   : > { %s1126_s8 = scalar_select %p936_p12, 1, 0 }
  0x17   : > { %s943_s10 = scalar_select %p39_p11, %s809_s17, %s41_s27  }
  0x18   : > { %s554_s11 = sshll.u32 %s180_s9, 5  ;;  %s555_s12 = sshll.u32 %s825_s21, 3 }
  0x19   : > { %s189_s13 = sadd.s32 %s821_s20, %s555_s12  ;;  %s184_s14 = scalar_lea.vmem [#allocation2], %s554_s11 }
  0x1a   : > { %s192_s23 = sshll.u32 %s184_s14, 4  ;;  %s556_s25 = sshll.u32 %s189_s13, 7  ;;  %s947_s23 = int_to_ptr.vmem [resolvable:$true] %s192_s23 }
  0x1b   : > { %s952_s28 = scalar_lea.hbm %s1113_s0, %s556_s25  ;;  %p956_p0 = pnand %p618_p13, %p918_p3 }
  0x1c   : > { %s960_s6 = scalar_lea.sflag [#allocation3], %s180_s9  ;;  %s701_s7 = scalar_lea.hbm %s952_s28, 512 }
  0x1d   : > { %p702_p1 = scmp.ne.s32.totalorder %s952_s28, %s701_s7  ;;  %p703_p2 = pneg %p956_p0 }
  0x1e   : > { %s706_s29 = scalar_lea.hbm %s1113_s0, 2048  ;;  %p707_p3 = scmp.lt.u32.totalorder %s952_s28, %s1113_s0 }
  0x1f   : > { %p704_p4 = pnand %p703_p2, %p702_p1  ;;  %p708_p6 = scmp.lt.u32.totalorder %s706_s29, %s701_s7 }
  0x20   : > { %p710_p10 = scmp.lt.u32.totalorder %s701_s7, %s952_s28 }
  0x21   : > { %p705_p5 = pneg %p704_p4  ;;  %p709_p7 = por %p708_p6, %p707_p3 }
  0x23   : > { %p711_p11 = por %p710_p10, %p709_p7 }
  0x25   : > { %p712_p13 = pnand %p711_p11, %p705_p5 }
  0x27   : > { %715 = shalt.err (!%p712_p13)
}
  0x28   : > { %s716_s9 = scalar_lea.vmem %s947_s23, 512  ;;  %s831_s13 = smov [#allocation2]  }
  0x29   : > { %p717_p1 = scmp.ne.s32.totalorder %s947_s23, %s716_s9  ;;  %s721_s14 = sshll.u32 %s831_s13, 4  ;;  %s722_s14 = int_to_ptr.vmem [resolvable:$false] %s721_s14 }
  0x2a   : > { %s723_s24 = scalar_lea.vmem %s722_s14, 1024  ;;  %p724_p9 = scmp.lt.s32.totalorder %s947_s23, %s722_s14 }
  0x2b   : > { %p719_p4 = pnand %p717_p1, %p703_p2  ;;  %p725_p3 = scmp.lt.s32.totalorder %s723_s24, %s716_s9 }
  0x2d   : > { %p720_p12 = pneg %p719_p4  ;;  %p726_p6 = por %p725_p3, %p724_p9 }
  0x2f   : > { %p727_p7 = pnand %p726_p6, %p720_p12 }
  0x31   : > { %730 = shalt.err (!%p727_p7)
}
  0x32   : > { %s832_s7 = smov 256   ;;  %s833_s25 = smov 128  }
  0x33   : > { %s834_s26 = smov 8   ;;  %p557_p2 = scmp.ge.s32.totalorder %s829_s22, 1 }
  0x34   : > { %613 = dma.hbm_to_vmem [thread:$0]  (!%p956_p0), %s952_s28, 512, %s947_s23, %s960_s6, %s832_s7, %s833_s25, %s834_s26  }
  0x35   : > { %p208_p5 = scmp.lt.s32.totalorder %s829_s22, 5 }
  0x37   : > { %p209_p10 = pnand %p557_p2, %p208_p5 }
  0x38   : > { %s991_s29 = sand.u32 (!%p209_p10), 1, %s805_s16  }
  0x39   : > { %212 = sbr.rel (%p209_p10) target bundleno = 330 (0x14a), region = 36  ;;  %s558_s11 = sshll.u32 (!%p209_p10), %s991_s29, 5 }
  0x3a   : > { %s215_s12 = scalar_lea.sflag (!%p209_p10), [#allocation3], %s991_s29  ;;  %s218_s9 = scalar_lea.vmem (!%p209_p10), [#allocation2], %s558_s11 }
  0x40   : > { %792 = dma.done.wait (%p926_p8), %s215_s12, 512  }
  0x41   : > { %794 = vsyncadd (%p926_p8), %s215_s12, 4294966784  ;;  %v835_v0 = vmov 0   ;;  %p248_p9 = scmp.lt.s32.totalorder %s817_s19, 1  ;;  %vm285_vm0 = vcmask 261120   ;;  %v1002_v1 = vld [vmem:[%s218_s9] sm:$0xff]  ;;  %v1004_v2 = vld [vmem:[%s218_s9 + $0x8] sm:$0xff] }
  0x42   : > { %692 = vset.pattern.permute.xlu1 %v835_v0  ;;  %691 = vset.pattern.permute.xlu0 %v835_v0  ;;  %v1006_v3 = vld [vmem:[%s218_s9 + $0x10] sm:$0xff]  ;;  %v594_v4 = vpack.c.bf16 %v1004_v2, %v1002_v1  ;;  %v1010_v5 = vld [vmem:[%s218_s9 + $0x18] sm:$0xff]  ;;  %v257_v6 = vld [vmem:[%s1114_s1] sm:$0xff]  ;;  %s567_s7 = sshll.u32 %s817_s19, 3  ;;  %s247_s26 = scalar_lea.vmem [#allocation5], %s558_s11 }
  0x43   : > { %v259_v7 = vld [vmem:[%s1114_s1 + $0x10] sm:$0xff]  ;;  %s249_s6 = scalar_select %p248_p9, %s817_s19, 1  ;;  %v598_v8 = vpack.c.bf16 %v1010_v5, %v1006_v3  ;;  %588 = vmatprep.mubr.msk.f32.mxu0 %vm285_vm0, %v257_v6  ;;  %v261_v10 = vld [vmem:[%s1115_s2] sm:$0xff]  ;;  %v264_v11 = vld [vmem:[%s1115_s2 + $0x18] sm:$0xff] }
  0x44   : > { %591 = vmatprep.mubr.msk.f32.mxu1 %vm285_vm0, %v259_v7  ;;  %595 = vmatprep.subr.bf16.mxu0 %v594_v4  ;;  %v263_v9 = vld [vmem:[%s1115_s2 + $0x10] sm:$0xff]  ;;  %v262_v12 = vld [vmem:[%s1115_s2 + $0x8] sm:$0xff]  ;;  %v260_v14 = vld [vmem:[%s1114_s1 + $0x18] sm:$0xff]  ;;  %s450_s12 = sshll.u32 %s247_s26, 4  ;;  %s436_s30 = scalar_lea.sflag [#allocation4], %s991_s29  ;;  %s1051_s12 = int_to_ptr.vmem [resolvable:$true] %s450_s12 }
  0x45   : > { %602 = vmatprep.subr.bf16.mxu1 %v594_v4  ;;  %597 = vmatpush3.bf16.msra.mxu0 %v594_v4  ;;  %s571_s25 = sshll.u32 %s249_s6, 5  ;;  %v258_v13 = vld [vmem:[%s1114_s1 + $0x8] sm:$0xff]  ;;  %s731_s23 = scalar_lea.vmem %s1051_s12, 512 }
  0x46   : > { %604 = vmatpush3.bf16.msra.mxu1 %v594_v4  ;;  %599 = vmatprep.subr.bf16.mxu0 %v598_v8  ;;  %s252_s24 = scalar_lea.vmem %s1116_s3, %s571_s25  ;;  %s447_s25 = sadd.s32 %s813_s18, %s567_s7 }
  0x47   : > { %603 = vmatprep.subr.bf16.mxu1 %v598_v8  ;;  %277 = vperm.xlu1 %692, %v263_v9   ;;  %v400_v15 = vld [vmem:[%s252_s24 + $0x8] sm:$0xff]  ;;  %v399_v16 = vld [vmem:[%s252_s24] sm:$0xff]  ;;  %v402_v17 = vld [vmem:[%s252_s24 + $0x18] sm:$0xff]  ;;  %s568_s19 = sshll.u32 %s447_s25, 7  ;;  %p732_p8 = scmp.ne.s32.totalorder %s1051_s12, %s731_s23 }
  0x48   : > { %267 = vperm.xlu0 %691, %v261_v10   ;;  %v401_v18 = vld [vmem:[%s252_s24 + $0x10] sm:$0xff]  ;;  %s1058_s9 = scalar_lea.hbm %s1117_s4, %s568_s19  ;;  %p1128_p12 = scmp.ne.s32.totalorder %s1125_s5, 0 }
  0x49   : > { %601 = vmatpush3.bf16.msra.mxu0 %v598_v8  ;;  %s836_s28 = smov [#allocation5]  }
  0x4a   : > { %605 = vmatpush3.bf16.msra.mxu1 %v598_v8  ;;  %p733_p0 = pnand %p732_p8, %p1128_p12  ;;  %s735_s27 = sshll.u32 %s836_s28, 4  ;;  %s736_s27 = int_to_ptr.vmem [resolvable:$false] %s735_s27 }
  0x4b   : > { %282 = vperm.xlu1 %692, %v264_v11   ;;  %s737_s13 = scalar_lea.vmem %s736_s27, 1024  ;;  %p738_p13 = scmp.lt.s32.totalorder %s1051_s12, %s736_s27 }
  0x4c   : > { %272 = vperm.xlu0 %691, %v262_v12   ;;  %589 = vmatmul.mubr.msk.f32.vlgmr.msra.gmra.mrb[0].mxu0 %vm285_vm0, %v258_v13  ;;  %p734_p11 = pneg %p733_p0  ;;  %p739_p1 = scmp.lt.s32.totalorder %s737_s13, %s731_s23 }
  0x4d   : > { %592 = vmatmul.mubr.msk.f32.vlgmr.msra.gmra.mrb[0].mxu1 %vm285_vm0, %v260_v14 }
  0x4e   : > { %p740_p4 = por %p739_p1, %p738_p13 }
  0x4f   : > { %410 = vperm.xlu1 %692, %v400_v15  }
  0x50   : > { %405 = vperm.xlu0 %691, %v399_v16   ;;  %p741_p3 = pnand %p740_p4, %p734_p11 }
  0x53   : > { %420 = vperm.xlu1 %692, %v402_v17  }
  0x54   : > { %415 = vperm.xlu0 %691, %v401_v18  }
  0xc6   : > { %v278_v19 = vpop.permute.xlu1 %277 }
  0xc7   : > { %v268_v20 = vpop.permute.xlu0 %267 }
  0xca   : > { %v283_v21 = vpop.permute.xlu1 %282 }
  0xcb   : > { %v273_v22 = vpop.permute.xlu0 %272 }
  0xce   : > { %v411_v35 = vpop.permute.xlu1 %410 }
  0xcf   : > { %v406_v38 = vpop.permute.xlu0 %405 }
  0xd2   : > { %v421_v47 = vpop.permute.xlu1 %420 }
  0xd3   : > { %v416_v52 = vpop.permute.xlu0 %415 }
 0x11f   : > { %v590_v23 = vpop.f32.mrb[0].mxu0 }
 0x120   : > { %v593_v24 = vpop.f32.mrb[0].mxu1  ;;  %v370_v25 = vadd.f32 %v590_v23, %v273_v22  ;;  %v364_v27 = vpop.f32.mrb[1].mxu0 }
 0x121   : > { %v380_v26 = vadd.f32 %v593_v24, %v283_v21  ;;  %v374_v28 = vpop.f32.mrb[1].mxu1  ;;  %v365_v29 = vadd.f32 %v364_v27, %v268_v20 }
 0x122   : > { %v375_v30 = vadd.f32 %v374_v28, %v278_v19  ;;  %v384_v31 = vmul.f32 0.5, %v370_v25 }
 0x123   : > { %v386_v32 = vmul.f32 0.5, %v380_v26  ;;  %v383_v33 = vmul.f32 0.5, %v365_v29 }
 0x124   : > { %v385_v34 = vmul.f32 0.5, %v375_v30  ;;  %693 = vtanh.f32 %v384_v31 }
 0x125   : > { %695 = vtanh.f32 %v386_v32 }
 0x126   : > { %697 = vtanh.f32 %v383_v33 }
 0x127   : > { %699 = vtanh.f32 %v385_v34 }
 0x12e   : > { %v694_v36 = vpop.eup %693 }
 0x12f   : > { %v696_v37 = vpop.eup %695  ;;  %v392_v39 = vmul.f32 0.5, %v694_v36 }
 0x130   : > { %v698_v40 = vpop.eup %697  ;;  %v394_v41 = vmul.f32 0.5, %v696_v37 }
 0x131   : > { %v700_v42 = vpop.eup %699  ;;  %v396_v43 = vadd.f32 0.5, %v392_v39  ;;  %v391_v44 = vmul.f32 0.5, %v698_v40 }
 0x132   : > { %v398_v45 = vadd.f32 0.5, %v394_v41  ;;  %v393_v46 = vmul.f32 0.5, %v700_v42 }
 0x133   : > { %v424_v48 = vadd.f32 %v411_v35, %v396_v43  ;;  %v395_v49 = vadd.f32 0.5, %v391_v44 }
 0x134   : > { %v426_v50 = vadd.f32 %v421_v47, %v398_v45  ;;  %v397_v51 = vadd.f32 0.5, %v393_v46 }
 0x135   : > { %v428_v53 = vmul.f32 %v424_v48, %v1004_v2  ;;  %v423_v54 = vadd.f32 %v406_v38, %v395_v49 }
 0x136   : > { %v430_v55 = vmul.f32 %v426_v50, %v1010_v5  ;;  %v425_v56 = vadd.f32 %v416_v52, %v397_v51 }
 0x137   : > { %432 = vst [vmem:[%s247_s26 + $0x8] sm:$0xff] %v428_v53  ;;  %v427_v57 = vmul.f32 %v423_v54, %v1002_v1 }
 0x138   : > { %434 = vst [vmem:[%s247_s26 + $0x18] sm:$0xff] %v430_v55  ;;  %v429_v58 = vmul.f32 %v425_v56, %v1006_v3 }
 0x139   : > { %431 = vst [vmem:[%s247_s26] sm:$0xff] %v427_v57 }
 0x13a   : > { %433 = vst [vmem:[%s247_s26 + $0x10] sm:$0xff] %v429_v58 }
 0x13b   : > { %744 = shalt.err (!%p741_p3)
}
 0x13c   : > { %s745_s6 = scalar_lea.hbm %s1058_s9, 512  ;;  %s749_s7 = scalar_lea.hbm %s1117_s4, 2048 }
 0x13d   : > { %p746_p6 = scmp.ne.s32.totalorder %s1058_s9, %s745_s6  ;;  %p750_p5 = scmp.lt.u32.totalorder %s1058_s9, %s1117_s4 }
 0x13e   : > { %p751_p10 = scmp.lt.u32.totalorder %s749_s7, %s745_s6  ;;  %p753_p8 = scmp.lt.u32.totalorder %s745_s6, %s1058_s9 }
 0x13f   : > { %p747_p7 = pnand %p746_p6, %p1128_p12 }
 0x140   : > { %p752_p9 = por %p751_p10, %p750_p5 }
 0x141   : > { %p748_p2 = pneg %p747_p7 }
 0x142   : > { %p754_p0 = por %p753_p8, %p752_p9 }
 0x144   : > { %p755_p11 = pnand %p754_p0, %p748_p2 }
 0x146   : > { %758 = shalt.err (!%p755_p11)
}
 0x147   : > { %s837_s19 = smov 128   ;;  %s838_s18 = smov 256  }
 0x148   : > { %s839_s11 = smov 8  }
 0x149   : > { %608 = dma.vmem_to_hbm [thread:$0]  (%p1128_p12), %s1051_s12, 512, %s1058_s9, %s436_s30, %s837_s19, %s838_s18, %s839_s11  }
 0x14a PF: > { %p619_p13 = scmp.ge.s32.totalorder %s829_s22, 2  ;;  %s465_s23 = sand.u32 1, %s801_s15  }
 0x14b   : > { %p1129_p1 = scmp.ne.s32.totalorder %s1126_s8, 0  ;;  %s466_s28 = scalar_lea.sflag [#allocation4], %s465_s23 }
 0x14d   : > { %p615_p4 = pnand %p619_p13, %p1129_p1 }
 0x14f   : > { %796 = dma.done.wait (!%p615_p4), %s466_s28, 512  }
 0x150   : > { %798 = vsyncadd (!%p615_p4), %s466_s28, 4294966784  ;;  %s20_s22 = sadd.s32 1, %s829_s22   ;;  %s1130_s5 = sld [smem:[#allocation8_spill]] }
 0x151   : > { %p17_p3 = scmp.ge.s32.totalorder %s20_s22, 6   ;;  %s1131_s29 = sld [smem:[#allocation9_spill]] }
 0x152   : > { %s1132_s15 = smov %s805_s16  ;;  %s1133_s16 = smov %s809_s17 }
 0x153   : > { %s1134_s17 = smov %s943_s10  ;;  %s1135_s18 = smov %s821_s20 }
 0x154   : > { %s1136_s19 = smov %s825_s21  ;;  %19 = sbr.rel (!%p17_p3) target bundleno = 7 (0x7), region = 84 }
 0x156   : > { %s1137_s20 = smov %s1130_s5 }
 0x157   : > { %s1138_s21 = smov %s1131_s29 }
 0x15b   :  { %471 = vsyncpa [#allocation3], 1 }
 0x15c   :  { %473 = vsyncpa [#allocation3 + $0x1], 1 }
 0x15d   :  { %474 = vsyncpa [#allocation4], 1 }
 0x15e   :  { %476 = vsyncpa [#allocation4 + $0x1], 1 }

</bundles_post_ra>
